<compile_context>
chip_gen: v6e
topology: v6e:2x2x1
jax: 0.10.0
libtpu: 0.0.40
codegen_flags: <defaults>
</compile_context>

<pallas_src>
import functools

import jax
import jax.numpy as jnp
from jax.experimental import pallas as pl
from jax.experimental.pallas import tpu as pltpu


def _round_up(x, m):
    return ((x + m - 1) // m) * m


# ----------------------------- kernels ------------------------------------- #

def _pool_kernel(x_ref, sum_ref, *, true_s, tile_s, need_mask):
    # x_ref: (1, C, tS) tile of x ; sum_ref: (1, C, 1) f32, resident across the
    # spatial-tile (reduction) grid axis.
    si = pl.program_id(1)

    @pl.when(si == 0)
    def _():
        sum_ref[...] = jnp.zeros_like(sum_ref)

    xv = x_ref[...].astype(jnp.float32)
    if need_mask:
        # Only the ragged last tile has out-of-bounds (garbage) lanes; mask them
        # to zero so the running sum stays exact.  Cheap VPU work hidden under
        # the HBM-bound DMA.
        lane = jax.lax.broadcasted_iota(jnp.int32, xv.shape, 2)
        xv = jnp.where(lane < (true_s - si * tile_s), xv, 0.0)

    sum_ref[...] += jnp.sum(xv, axis=-1, keepdims=True)

    @pl.when(si == pl.num_programs(1) - 1)
    def _():
        # Divide by the TRUE spatial size.
        sum_ref[...] = sum_ref[...] * (1.0 / float(true_s))


def _excite_kernel(y_ref, w1t_ref, w2t_ref, s_ref):
    # y_ref: (B, C) f32 pooled ; w1t: (C, C//r) ; w2t: (C//r, C) ; s_ref: (B, C)
    y = y_ref[...]
    h = jnp.dot(y, w1t_ref[...].astype(jnp.float32),
                preferred_element_type=jnp.float32)          # (B, C//r)
    h = jnp.maximum(h, 0.0)                                  # ReLU
    s = jnp.dot(h, w2t_ref[...].astype(jnp.float32),
                preferred_element_type=jnp.float32)          # (B, C)
    s_ref[...] = jax.nn.sigmoid(s)                           # Sigmoid


def _scale_kernel(s_ref, x_ref, o_ref):
    # s_ref: (1, C, 1) per-batch channel scales ; x/o: (1, C, tS) tiles.
    x = x_ref[...]
    o_ref[...] = x * s_ref[...].astype(x.dtype)              # broadcast over tS


# ----------------------------- wrapper -------------------------------------- #

def se_layer(x, w1, w2, *, max_tile=4096):
    """x: (B, C, D, H, W); w1: (C//r, C); w2: (C, C//r). Matches SELayer.forward."""
    B, C, D, H, W = x.shape
    S = D * H * W
    Ch = w1.shape[0]
    elt = jnp.dtype(x.dtype).itemsize

    # Lane-dense spatial tile: multiple of 128, sized so (x-in + x-out) double
    # buffered stays ~<= 8 MiB (safe under v5e 16 MiB / v7x 32 MiB scoped VMEM).
    vmem_budget = 8 * 1024 * 1024
    ts = max(128, (vmem_budget // (4 * C * elt)) // 128 * 128)
    ts = min(ts, max_tile, _round_up(S, 128))
    n_s = pl.cdiv(S, ts)
    need_mask = (S % ts) != 0

    # Collapsing trailing dims is a free (contiguous) reshape -- no HBM copy.
    xr = x.reshape(B, C, S)

    vmem_cap = 32 * 1024 * 1024

    # ---- pass 1: global average pool (squeeze) -> (B, C, 1) f32 ----
    pooled = pl.pallas_call(
        functools.partial(_pool_kernel, true_s=S, tile_s=ts, need_mask=need_mask),
        out_shape=jax.ShapeDtypeStruct((B, C, 1), jnp.float32),
        grid=(B, n_s),
        in_specs=[pl.BlockSpec((1, C, ts), lambda b, si: (b, 0, si))],
        out_specs=pl.BlockSpec((1, C, 1), lambda b, si: (b, 0, 0)),
        compiler_params=pltpu.CompilerParams(
            dimension_semantics=("parallel", "arbitrary"),
            vmem_limit_bytes=vmem_cap),
        cost_estimate=pl.CostEstimate(
            flops=B * C * S, transcendentals=0,
            bytes_accessed=B * C * S * elt + B * C * 4),
    )(xr)

    # ---- pass 2: excitation MLP, batched over B (real N dim) ----
    # PyTorch Linear stores weight as (out, in); pre-transpose (tiny) so the
    # kernel does row-major (B, C) @ (C, Ch) / (B, Ch) @ (Ch, C).
    scale = pl.pallas_call(
        _excite_kernel,
        out_shape=jax.ShapeDtypeStruct((B, C), jnp.float32),
        grid=(1,),
        in_specs=[pl.BlockSpec((B, C), lambda i: (0, 0)),
                  pl.BlockSpec((C, Ch), lambda i: (0, 0)),
                  pl.BlockSpec((Ch, C), lambda i: (0, 0))],
        out_specs=pl.BlockSpec((B, C), lambda i: (0, 0)),
        compiler_params=pltpu.CompilerParams(vmem_limit_bytes=vmem_cap),
        cost_estimate=pl.CostEstimate(
            flops=4 * B * C * Ch, transcendentals=B * C,
            bytes_accessed=(2 * B * C + 2 * C * Ch) * 4),
    )(pooled.reshape(B, C), w1.T, w2.T)

    # ---- pass 3: channel-wise rescale of x (HBM-bound, lane-dense tiles) ----
    # Last ragged tile: reads past S are garbage but their products are never
    # stored (Pallas clips out-of-bounds writes), so output is exact without
    # any padding or post-slice copies.
    out = pl.pallas_call(
        _scale_kernel,
        out_shape=jax.ShapeDtypeStruct((B, C, S), x.dtype),
        grid=(B, n_s),
        in_specs=[pl.BlockSpec((1, C, 1), lambda b, si: (b, 0, 0)),
                  pl.BlockSpec((1, C, ts), lambda b, si: (b, 0, si))],
        out_specs=pl.BlockSpec((1, C, ts), lambda b, si: (b, 0, si)),
        compiler_params=pltpu.CompilerParams(
            dimension_semantics=("parallel", "parallel"),
            vmem_limit_bytes=vmem_cap),
        cost_estimate=pl.CostEstimate(
            flops=B * C * S, transcendentals=0,
            bytes_accessed=2 * B * C * S * elt + B * C * 4),
    )(scale.reshape(B, C, 1), xr)

    return out.reshape(B, C, D, H, W)


def se_layer_ref(x, w1, w2):
    """Pure-JAX reference matching the PyTorch forward."""
    B, C = x.shape[0], x.shape[1]
    y = jnp.mean(x, axis=(2, 3, 4))                 # AdaptiveAvgPool3d(1)
    y = jnp.maximum(y @ w1.T, 0.0)                  # Linear(C, C//r) + ReLU
    y = jax.nn.sigmoid(y @ w2.T)                    # Linear(C//r, C) + Sigmoid
    return x * y.reshape(B, C, 1, 1, 1)


if __name__ == "__main__":
    # Small shapes consistent with SELayer(channel=32, reduction=16) on a 3D volume.
    B, C, D, H, W = 2, 32, 4, 4, 4
    reduction = 16
    Ch = C // reduction

    key = jax.random.PRNGKey(0)
    kx, k1, k2 = jax.random.split(key, 3)
    x = jax.random.normal(kx, (B, C, D, H, W), dtype=jnp.float32)
    # Linear(..., bias=False) weights, PyTorch layout (out, in).
    w1 = jax.random.normal(k1, (Ch, C), dtype=jnp.float32) * 0.1
    w2 = jax.random.normal(k2, (C, Ch), dtype=jnp.float32) * 0.1

    out = se_layer(x, w1, w2)
    out = jax.block_until_ready(out)

    ref = se_layer_ref(x, w1, w2)
    assert out.shape == x.shape
    assert jnp.allclose(out, ref, atol=1e-5, rtol=1e-5), "mismatch vs reference"

    print("KERNEL_OK")
</pallas_src>

<mosaic_0001>
module attributes {stable_mosaic.version = 11 : i64} {
  func.func @_pool_kernel(%arg0: i32, %arg1: i32, %arg2: memref<1x32x128xf32, #tpu.memory_space<vmem>>, %arg3: memref<1x32x1xf32, #tpu.memory_space<vmem>>) attributes {dimension_semantics = [#tpu.dimension_semantics<parallel>, #tpu.dimension_semantics<arbitrary>], iteration_bounds = array<i64: 2, 1>, scalar_prefetch = 0 : i64, scratch_operands = 0 : i64, tpu.core_type = #tpu.core_type<tc>, window_params = [{transform_indices = @transform_0, window_bounds = array<i64: 1, 32, 128>}, {transform_indices = @transform_1, window_bounds = array<i64: 1, 32, 1>}]} {
    %c0_i32 = arith.constant 0 : i32
    %0 = arith.cmpi eq, %arg1, %c0_i32 : i32
    %1 = arith.extui %0 : i1 to i32
    %c0_i32_0 = arith.constant 0 : i32
    %2 = arith.cmpi ne, %1, %c0_i32_0 : i32
    scf.if %2 {
      %cst_12 = arith.constant 0.000000e+00 : f32
      %19 = vector.broadcast %cst_12 : f32 to vector<1x32x1xf32>
      %c0_13 = arith.constant 0 : index
      %c0_14 = arith.constant 0 : index
      %c0_15 = arith.constant 0 : index
      %20 = vector.load %arg3[%c0_13, %c0_14, %c0_15] : memref<1x32x1xf32, #tpu.memory_space<vmem>>, vector<1x32x1xf32>
      tpu.vector_store %arg3[%c0_13, %c0_14, %c0_15], %19 {strides = array<i32>} : memref<1x32x1xf32, #tpu.memory_space<vmem>>, vector<1x32x1xf32>,
    } else {
    }
    %c0 = arith.constant 0 : index
    %c0_1 = arith.constant 0 : index
    %c0_2 = arith.constant 0 : index
    %3 = vector.load %arg2[%c0, %c0_1, %c0_2] : memref<1x32x128xf32, #tpu.memory_space<vmem>>, vector<1x32x128xf32>
    %4 = tpu.iota {dimensions = array<i32: 2>} : vector<1x32x128xi32>
    %c128_i32 = arith.constant 128 : i32
    %5 = arith.muli %arg1, %c128_i32 : i32
    %c64_i32 = arith.constant 64 : i32
    %6 = arith.subi %c64_i32, %5 : i32
    %7 = vector.broadcast %6 : i32 to vector<1x32x128xi32>
    %8 = arith.cmpi slt, %4, %7 : vector<1x32x128xi32>
    %cst = arith.constant 0.000000e+00 : f32
    %9 = vector.broadcast %cst : f32 to vector<1x32x128xf32>
    %10 = arith.select %8, %3, %9 : vector<1x32x128xi1>, vector<1x32x128xf32>
    %c0_3 = arith.constant 0 : index
    %c0_4 = arith.constant 0 : index
    %c0_5 = arith.constant 0 : index
    %11 = vector.load %arg3[%c0_3, %c0_4, %c0_5] : memref<1x32x1xf32, #tpu.memory_space<vmem>>, vector<1x32x1xf32>
    %cst_6 = arith.constant dense<0.000000e+00> : vector<1x32xf32>
    %12 = vector.multi_reduction <add>, %10, %cst_6 [2] : vector<1x32x128xf32> to vector<1x32xf32>
    %13 = vector.shape_cast %12 : vector<1x32xf32> to vector<1x32x1xf32>
    %14 = arith.addf %11, %13 : vector<1x32x1xf32>
    %c0_7 = arith.constant 0 : index
    %c0_8 = arith.constant 0 : index
    %c0_9 = arith.constant 0 : index
    %15 = vector.load %arg3[%c0_7, %c0_8, %c0_9] : memref<1x32x1xf32, #tpu.memory_space<vmem>>, vector<1x32x1xf32>
    tpu.vector_store %arg3[%c0_7, %c0_8, %c0_9], %14 {strides = array<i32>} : memref<1x32x1xf32, #tpu.memory_space<vmem>>, vector<1x32x1xf32>,
    %c0_i32_10 = arith.constant 0 : i32
    %16 = arith.cmpi eq, %arg1, %c0_i32_10 : i32
    %17 = arith.extui %16 : i1 to i32
    %c0_i32_11 = arith.constant 0 : i32
    %18 = arith.cmpi ne, %17, %c0_i32_11 : i32
    scf.if %18 {
      %c0_12 = arith.constant 0 : index
      %c0_13 = arith.constant 0 : index
      %c0_14 = arith.constant 0 : index
      %19 = vector.load %arg3[%c0_12, %c0_13, %c0_14] : memref<1x32x1xf32, #tpu.memory_space<vmem>>, vector<1x32x1xf32>
      %cst_15 = arith.constant 1.562500e-02 : f32
      %20 = vector.broadcast %cst_15 : f32 to vector<1x32x1xf32>
      %21 = arith.mulf %19, %20 : vector<1x32x1xf32>
      %c0_16 = arith.constant 0 : index
      %c0_17 = arith.constant 0 : index
      %c0_18 = arith.constant 0 : index
      %22 = vector.load %arg3[%c0_16, %c0_17, %c0_18] : memref<1x32x1xf32, #tpu.memory_space<vmem>>, vector<1x32x1xf32>
      tpu.vector_store %arg3[%c0_16, %c0_17, %c0_18], %21 {strides = array<i32>} : memref<1x32x1xf32, #tpu.memory_space<vmem>>, vector<1x32x1xf32>,
    } else {
    }
    return
  }
  func.func @transform_0(%arg0: i32, %arg1: i32) -> (i32, i32, i32) {
    %c0_i32 = arith.constant 0 : i32
    %c0_i32_0 = arith.constant 0 : i32
    return %arg0, %c0_i32, %arg1 : i32, i32, i32
  }
  func.func @transform_1(%arg0: i32, %arg1: i32) -> (i32, i32, i32) {
    %c0_i32 = arith.constant 0 : i32
    %c0_i32_0 = arith.constant 0 : i32
    %c0_i32_1 = arith.constant 0 : i32
    return %arg0, %c0_i32, %c0_i32_0 : i32, i32, i32
  }
}

</mosaic_0001>

<bundles_post_ra>
// kernel: tpu_custom_call.1
= control target key start
LH: loop header
LB: loop body
LE: loop exit
PB: predicated region body
PF: predicated region fallthrough
CT: control target
= control target key end

     0   :  { %6 = vsyncpa [#allocation3], 0  ;;  %s589_s0 = inlined_call_operand.hbm [shape: f32[2,32,64], index: 0, kind: input, shape index: {}]   ;;  %s590_s1 = inlined_call_operand.vmem [shape: f32[2,32,1], index: 1, kind: output, shape index: {}]  }
   0x1   :  { %8 = vsyncpa [#allocation3 + $0x1], 0  ;;  %s455_s6 = smov 0   ;;  %s457_s7 = smov 0  }
   0x2   :  { %s459_s8 = smov 0   ;;  %s461_s9 = smov 0  }
   0x3   :  { %s463_s10 = smov 0   ;;  %s465_s11 = smov 0  }
   0x4 LB: > { %s288_s12 = sadd.s32 4294967295, %s439_s11   ;;  %s26_s13 = sadd.s32 1, %s435_s10  ;;  %s439_s11 = sphi %s465_s11, %s14_s11   ;;  %s435_s10 = sphi %s463_s10, %s598_s10   ;;  %s431_s9 = sphi %s461_s9, %s597_s9   ;;  %s427_s8 = sphi %s459_s8, %s596_s8   ;;  %s423_s7 = sphi %s457_s7, %s595_s7   ;;  %s419_s6 = sphi %s455_s6, %s594_s6  }
   0x5   : > { %p28_p0 = scmp.ge.s32.totalorder %s26_s13, 2  ;;  %s35_s14 = sadd.s32 1, %s427_s8 }
   0x6   : > { %p42_p1 = scmp.ne.s32.totalorder %s427_s8, %s423_s7  ;;  %p43_p2 = scmp.eq.s32.totalorder %s439_s11, 0 }
   0x7   : > { %s600_s13 = smov (%p28_p0, %s26_s13), 0  ;;  %p48_p4 = scmp.ne.s32.totalorder %s423_s7, %s419_s6 }
   0x8   : > { %p491_p3 = por %p43_p2, %p42_p1  ;;  %s30_s16 = ssub.s32 %s435_s10, %s600_s13 }
   0x9   : > { %p49_p5 = scmp.eq.s32.totalorder %s288_s12, 0  ;;  %p33_p6 = scmp.eq.s32.totalorder %s30_s16, 0 }
   0xa   : > { %p309_p8 = scmp.lt.s32.totalorder %s439_s11, 2  ;;  %s98_s19 = sand.u32 1, %s427_s8  }
   0xb   : > { %p498_p7 = por %p49_p5, %p48_p4  ;;  %s301_s20 = sshll.u32 %s435_s10, 9 }
   0xc   : > { %s504_s18 = scalar_select %p33_p6, %s427_s8, %s35_s14  }
   0xd   : > { %s292_s21 = sshll.u32 %s98_s19, 5  ;;  %s109_s24 = scalar_lea.hbm %s589_s0, %s301_s20 }
   0xe   : > { %s102_s25 = scalar_lea.vmem [#allocation2], %s292_s21  ;;  %p513_p9 = pnand %p309_p8, %p491_p3 }
   0xf   : > { %s110_s26 = sshll.u32 %s102_s25, 4  ;;  %s99_s28 = scalar_lea.sflag [#allocation3], %s98_s19  ;;  %s111_s26 = int_to_ptr.vmem [resolvable:$true] %s110_s26 }
  0x10   : > { %p363_p10 = pneg %p513_p9  ;;  %s374_s29 = scalar_lea.vmem %s111_s26, 512 }
  0x11   : > { %p375_p11 = scmp.ne.s32.totalorder %s111_s26, %s374_s29  ;;  %s441_s30 = smov [#allocation2]  }
  0x12   : > { %s379_s2 = sshll.u32 %s441_s30, 4  ;;  %s380_s2 = int_to_ptr.vmem [resolvable:$false] %s379_s2 }
  0x13   : > { %p377_p12 = pnand %p375_p11, %p363_p10  ;;  %s381_s3 = scalar_lea.vmem %s380_s2, 1024 }
  0x14   : > { %p382_p0 = scmp.lt.s32.totalorder %s111_s26, %s380_s2  ;;  %p383_p1 = scmp.lt.s32.totalorder %s381_s3, %s374_s29 }
  0x15   : > { %p378_p13 = pneg %p377_p12 }
  0x16   : > { %p384_p2 = por %p383_p1, %p382_p0 }
  0x18   : > { %p385_p3 = pnand %p384_p2, %p378_p13 }
  0x1a   : > { %388 = shalt.err (!%p385_p3)
}
  0x1b   : > { %s442_s4 = smov 128   ;;  %s443_s5 = smov 8  }
  0x1c   : > { %308 = dma.hbm_to_vmem [thread:$0]  (!%p513_p9), %s109_s24, 512, %s111_s26, %s99_s28, %s442_s4, %s442_s4, %s443_s5  }
  0x1d   : > { %p295_p4 = scmp.ge.s32.totalorder %s439_s11, 1  ;;  %p118_p5 = scmp.lt.s32.totalorder %s439_s11, 3 }
  0x1f   : > { %p119_p6 = pnand %p295_p4, %p118_p5 }
  0x20   : > { %s124_s6 = sand.u32 (!%p119_p6), 1, %s423_s7  }
  0x21   : > { %122 = sbr.rel (%p119_p6) target bundleno = 200 (0xc8), region = 24  ;;  %s296_s12 = sshll.u32 (!%p119_p6), %s124_s6, 5 }
  0x22   : > { %s125_s14 = scalar_lea.sflag (!%p119_p6), [#allocation3], %s124_s6  ;;  %s128_s15 = scalar_lea.vmem (!%p119_p6), [#allocation2], %s296_s12 }
  0x26   : > { %414 = dma.done.wait (%p498_p7), %s125_s14, 512  }
  0x27   : > { %416 = vsyncadd (%p498_p7), %s125_s14, 4294966784  ;;  %v165_v0 = vlaneseq  ;;  %p147_p8 = scmp.lt.s32.totalorder %s431_s9, 1  ;;  %vm156_vm0 = vcmask 7168   ;;  %v444_v2 = vmov 0.0   ;;  %v163_v3 = vld [vmem:[%s128_s15 + $0x10] sm:$0xff]  ;;  %v161_v4 = vld [vmem:[%s128_s15] sm:$0xff] }
  0x28   : > { %v164_v5 = vld [vmem:[%s128_s15 + $0x18] sm:$0xff]  ;;  %v162_v8 = vld [vmem:[%s128_s15 + $0x8] sm:$0xff] }
  0x29   : > { %v166_v1 = vand.u32 127, %v165_v0  ;;  %s602_s9 = smov (!%p147_p8, %s431_s9), 1 }
  0x2a   : > { %s302_s16 = sshll.u32 %s602_s9, 5 }
  0x2b   : > { %vm170_vm1 = vcmp.lt.s32.totalorder %v166_v1, 64  ;;  %s533_s21 = scalar_lea.vmem %s590_s1, %s302_s16 }
  0x2c   : > { %159 = vst.msk [vmem:[%s533_s21 + $0x10] sm:$0xff] %vm156_vm0, %v444_v2  ;;  %157 = vst.msk [vmem:[%s533_s21] sm:$0xff] %vm156_vm0, %v444_v2  ;;  %v173_v6 = vsel %vm170_vm1, %v163_v3, 0.0  ;;  %v171_v7 = vsel %vm170_vm1, %v161_v4, 0.0  ;;  %v174_v9 = vsel %vm170_vm1, %v164_v5, 0.0  ;;  %v172_v10 = vsel %vm170_vm1, %v162_v8, 0.0 }
  0x2d   : > { %158 = vst.msk [vmem:[%s533_s21 + $0x8] sm:$0xff] %vm156_vm0, %v444_v2  ;;  %160 = vst.msk [vmem:[%s533_s21 + $0x18] sm:$0xff] %vm156_vm0, %v444_v2  ;;  %183 = vadd.xlane.f32.xlu1 %v173_v6  ;;  %179 = vadd.xlane.f32.xlu0 %v171_v7 }
  0x31   : > { %185 = vadd.xlane.f32.xlu1 %v174_v9  ;;  %181 = vadd.xlane.f32.xlu0 %v172_v10 }
  0x33   : > { %v177_v11 = vld [vmem:[%s533_s21 + $0x10] sm:$0xff]  ;;  %v175_v12 = vld [vmem:[%s533_s21] sm:$0xff] }
  0x34   : > { %v178_v17 = vld [vmem:[%s533_s21 + $0x18] sm:$0xff]  ;;  %v176_v18 = vld [vmem:[%s533_s21 + $0x8] sm:$0xff] }
  0xb6   : > { %v184_v13 = vpop.xlane.xlu1 %183  ;;  %v180_v14 = vpop.xlane.xlu0 %179 }
  0xb7   : > { %v189_v15 = vadd.f32 %v184_v13, %v177_v11  ;;  %v187_v16 = vadd.f32 %v180_v14, %v175_v12 }
  0xb9   : > { %194 = vst.msk [vmem:[%s533_s21 + $0x10] sm:$0xff] %vm156_vm0, %v189_v15  ;;  %192 = vst.msk [vmem:[%s533_s21] sm:$0xff] %vm156_vm0, %v187_v16 }
  0xba   : > { %v186_v19 = vpop.xlane.xlu1 %185  ;;  %v182_v20 = vpop.xlane.xlu0 %181 }
  0xbb   : > { %v190_v21 = vadd.f32 %v186_v19, %v178_v17  ;;  %v188_v22 = vadd.f32 %v182_v20, %v176_v18 }
  0xbd   : > { %195 = vst.msk [vmem:[%s533_s21 + $0x18] sm:$0xff] %vm156_vm0, %v190_v21  ;;  %193 = vst.msk [vmem:[%s533_s21 + $0x8] sm:$0xff] %vm156_vm0, %v188_v22 }
  0xc0   : > { %v201_v23 = vld [vmem:[%s533_s21 + $0x10] sm:$0xff]  ;;  %v199_v24 = vld [vmem:[%s533_s21] sm:$0xff] }
  0xc1   : > { %v205_v25 = vmul.f32 0.015625, %v201_v23  ;;  %v203_v26 = vmul.f32 0.015625, %v199_v24 }
  0xc3   : > { %209 = vst.msk [vmem:[%s533_s21 + $0x10] sm:$0xff] %vm156_vm0, %v205_v25  ;;  %207 = vst.msk [vmem:[%s533_s21] sm:$0xff] %vm156_vm0, %v203_v26 }
  0xc4   : > { %v202_v27 = vld [vmem:[%s533_s21 + $0x18] sm:$0xff]  ;;  %v200_v28 = vld [vmem:[%s533_s21 + $0x8] sm:$0xff] }
  0xc5   : > { %v206_v29 = vmul.f32 0.015625, %v202_v27  ;;  %v204_v30 = vmul.f32 0.015625, %v200_v28 }
  0xc7   : > { %210 = vst.msk [vmem:[%s533_s21 + $0x18] sm:$0xff] %vm156_vm0, %v206_v29  ;;  %208 = vst.msk [vmem:[%s533_s21 + $0x8] sm:$0xff] %vm156_vm0, %v204_v30 }
  0xc8 PF: > { %s14_s11 = sadd.s32 1, %s439_s11   ;;  %s594_s6 = smov %s423_s7 }
  0xc9   : > { %p11_p7 = scmp.ge.s32.totalorder %s14_s11, 4   ;;  %s595_s7 = smov %s427_s8 }
  0xca   : > { %s596_s8 = smov %s504_s18  ;;  %s597_s9 = smov %s435_s10 }
  0xcb   : > { %s598_s10 = smov %s600_s13  ;;  %13 = sbr.rel (!%p11_p7) target bundleno = 4 (0x4), region = 72 }
  0xd0   :  { %232 = vsyncpa [#allocation3], 1 }
  0xd1   :  { %234 = vsyncpa [#allocation3 + $0x1], 1 }

</bundles_post_ra>
